<compile_context>
chip_gen: v6e
topology: v6e:2x2x1
jax: 0.10.0
libtpu: 0.0.40
codegen_flags: <defaults>
</compile_context>

<pallas_src>
import functools

import jax
import jax.numpy as jnp
from jax import lax
from jax.experimental import pallas as pl
from jax.experimental.pallas import tpu as pltpu


def _round_up(x, m):
    return (x + m - 1) // m * m


# ---------------------------------------------------------------------------
# Fused AttentionGate kernel (gridless, single VMEM-resident block)
# ---------------------------------------------------------------------------

def _attention_gate_kernel(gate_ref, skip_ref, w_ref,
                           cbias_ref, cgamma_ref, cbeta_ref,
                           wpsi_ref, cpsi_ref, out_ref,
                           *, n_imgs, feats, hw, inv_m, eps):
    """Single-block fused AttentionGate forward.

    gate_ref, skip_ref : (N*F, HW)      f32   NCHW activations, free-reshaped
    w_ref              : (2*NCp, 2*F)   f32   block-diagonal [W_gate | W_x] weight
    cbias/cgamma/cbeta : (2*NCp, 1)     f32   per-channel conv bias / BN gamma / BN beta
    wpsi_ref           : (NCp, 1)       f32   psi 1x1-conv weight (channel column)
    cpsi_ref           : (3,)           f32   SMEM: [psi conv bias, psi BN gamma, psi BN beta]
    out_ref            : (N*F, HW)      f32   skip * psi
    """
    ncp = w_ref.shape[0] // 2

    # Assemble one lane-dense MXU operand: [gate ; skip] stacked over channels
    # (sublanes), all images laid side-by-side along the lane axis.  NCHW-native:
    # no transpose anywhere, every access below is full lane width.
    gate_lanes = jnp.concatenate(
        [gate_ref[n * feats:(n + 1) * feats, :] for n in range(n_imgs)], axis=-1)  # (F, N*HW)
    skip_lanes = jnp.concatenate(
        [skip_ref[n * feats:(n + 1) * feats, :] for n in range(n_imgs)], axis=-1)  # (F, N*HW)
    acts = jnp.concatenate([gate_lanes, skip_lanes], axis=0)                       # (2F, N*HW)

    # Both branch 1x1 convs in ONE MXU pass (block-diagonal weight):
    #   rows [0, ncp)     -> g1 = W_gate @ gate
    #   rows [ncp, 2*ncp) -> x1 = W_x    @ skip
    t = jnp.dot(w_ref[...], acts, preferred_element_type=jnp.float32)              # (2NC, N*HW)
    t = t + cbias_ref[...]                                                          # conv bias

    # Training-mode BatchNorm for both branches at once: per-channel (per-row)
    # stats over the full N*H*W batch, biased variance, centered two-pass
    # (numerically stable, unlike E[x^2] - E[x]^2).
    mean = jnp.sum(t, axis=1, keepdims=True) * inv_m                                # (2NC, 1)
    cent = t - mean
    var = jnp.sum(cent * cent, axis=1, keepdims=True) * inv_m
    t = cent * lax.rsqrt(var + eps) * cgamma_ref[...] + cbeta_ref[...]

    # relu(g1 + x1): fold the two aligned sublane halves together.
    p = jnp.maximum(t[:ncp, :] + t[ncp:, :], 0.0)                                   # (NC, N*HW)

    # psi 1x1 conv (Cout = 1): weighted channel (sublane) sum + bias, then BN.
    s = jnp.sum(p * wpsi_ref[...], axis=0, keepdims=True) + cpsi_ref[0]             # (1, N*HW)
    s_mean = jnp.sum(s, axis=1, keepdims=True) * inv_m
    s_cent = s - s_mean
    s_var = jnp.sum(s_cent * s_cent, axis=1, keepdims=True) * inv_m
    s = s_cent * lax.rsqrt(s_var + eps) * cpsi_ref[1] + cpsi_ref[2]

    # Exact sigmoid (EUP exp + exact divide) for parity with torch.sigmoid.
    psi = 1.0 / (1.0 + jnp.exp(-s))                                                 # (1, N*HW)

    # Gate the skip connection.  skip is re-read at the point of use (no
    # long-lived f32 value across the BN region); stores are lane-dense slabs.
    for n in range(n_imgs):
        out_ref[n * feats:(n + 1) * feats, :] = (
            skip_ref[n * feats:(n + 1) * feats, :] * psi[:, n * hw:(n + 1) * hw])


@functools.partial(jax.jit, static_argnames=("eps",))
def attention_gate(gate_nchw, skip_nchw, params, eps=1e-5):
    """AttentionGate.forward.  Inputs NCHW (PyTorch layout), output NCHW."""
    N, F, H, W = gate_nchw.shape
    assert skip_nchw.shape == (N, F, H, W)
    HW = H * W
    # These keep every kernel access aligned/lane-dense; general shapes would need padding.
    assert F % 8 == 0, "features must be a multiple of 8 for this kernel"
    assert HW % 128 == 0, "H*W must be a multiple of 128 for lane-dense tiles"

    # Free reshapes (merge contiguous minor dims) -- no transposes, no HBM copies.
    gate2d = gate_nchw.reshape(N * F, HW)
    skip2d = skip_nchw.reshape(N * F, HW)

    kernel = functools.partial(_attention_gate_kernel, n_imgs=N, feats=F, hw=HW,
                               inv_m=1.0 / (N * HW), eps=eps)
    vmem = pl.BlockSpec(memory_space=pltpu.MemorySpace.VMEM)
    smem = pl.BlockSpec(memory_space=pltpu.MemorySpace.SMEM)

    out2d = pl.pallas_call(
        kernel,
        out_shape=jax.ShapeDtypeStruct((N * F, HW), jnp.float32),
        in_specs=[vmem, vmem, vmem, vmem, vmem, vmem, vmem, smem],
        out_specs=vmem,
        compiler_params=pltpu.CompilerParams(vmem_limit_bytes=32 * 1024 * 1024),
    )(gate2d, skip2d,
      params["w_cat"], params["cbias"], params["cgamma"], params["cbeta"],
      params["wpsi"], params["cpsi"])

    return out2d.reshape(N, F, H, W)


# ---------------------------------------------------------------------------
# Parameter construction (torch-layout weights -> fused kernel layout, once)
# ---------------------------------------------------------------------------

def make_raw_params(key, features, n_coefficients):
    """Synthetic torch-style parameters for a freshly constructed AttentionGate."""
    kg_w, kg_b, kx_w, kx_b, kp_w, kp_b = jax.random.split(key, 6)
    std1 = (1.0 / features) ** 0.5
    std2 = (1.0 / n_coefficients) ** 0.5
    return {
        "w_gate": (jax.random.normal(kg_w, (n_coefficients, features)) * std1).astype(jnp.float32),
        "b_gate": (jax.random.normal(kg_b, (n_coefficients,)) * 0.01).astype(jnp.float32),
        "w_x":    (jax.random.normal(kx_w, (n_coefficients, features)) * std1).astype(jnp.float32),
        "b_x":    (jax.random.normal(kx_b, (n_coefficients,)) * 0.01).astype(jnp.float32),
        "w_psi":  (jax.random.normal(kp_w, (1, n_coefficients)) * std2).astype(jnp.float32),
        "b_psi":  (jax.random.normal(kp_b, (1,)) * 0.01).astype(jnp.float32),
    }


def pack_params(raw, features, n_coefficients):
    """Pack torch-layout weights into the kernel's fused layout (done once, offline)."""
    f = features
    nc = n_coefficients
    ncp = _round_up(nc, 8)          # sublane-align the coefficient channels

    # Block-diagonal weight: one MXU pass computes both branch 1x1 convs.
    w_cat = jnp.zeros((2 * ncp, 2 * f), jnp.float32)
    w_cat = w_cat.at[:nc, :f].set(raw["w_gate"])
    w_cat = w_cat.at[ncp:ncp + nc, f:].set(raw["w_x"])

    bias = jnp.zeros((2 * ncp,), jnp.float32)
    bias = bias.at[:nc].set(raw["b_gate"]).at[ncp:ncp + nc].set(raw["b_x"])
    gamma = jnp.ones((2 * ncp,), jnp.float32)    # fresh BatchNorm2d: weight = 1
    beta = jnp.zeros((2 * ncp,), jnp.float32)    #                    bias   = 0

    wpsi = jnp.zeros((ncp, 1), jnp.float32).at[:nc, 0].set(raw["w_psi"][0])
    cpsi = jnp.array([raw["b_psi"][0], 1.0, 0.0], jnp.float32)  # psi conv bias, BN gamma, BN beta

    return {"w_cat": w_cat,
            "cbias": bias[:, None], "cgamma": gamma[:, None], "cbeta": beta[:, None],
            "wpsi": wpsi, "cpsi": cpsi}


# ---------------------------------------------------------------------------
# Pure-JAX reference of the PyTorch module (training-mode BN, batch stats)
# ---------------------------------------------------------------------------

def attention_gate_reference(gate, skip, raw, eps=1e-5):
    def bn(y):
        mean = y.mean(axis=(0, 2, 3), keepdims=True)
        var = ((y - mean) ** 2).mean(axis=(0, 2, 3), keepdims=True)   # biased variance
        return (y - mean) / jnp.sqrt(var + eps)                       # gamma=1, beta=0
    g1 = bn(jnp.einsum("oc,nchw->nohw", raw["w_gate"], gate) + raw["b_gate"][None, :, None, None])
    x1 = bn(jnp.einsum("oc,nchw->nohw", raw["w_x"], skip) + raw["b_x"][None, :, None, None])
    p = jnp.maximum(g1 + x1, 0.0)
    s = bn(jnp.einsum("oc,nchw->nohw", raw["w_psi"], p) + raw["b_psi"][None, :, None, None])
    return skip * jax.nn.sigmoid(s)


# ---------------------------------------------------------------------------
# Main
# ---------------------------------------------------------------------------

if __name__ == "__main__":
    key = jax.random.PRNGKey(0)
    k_gate, k_skip, k_params = jax.random.split(key, 3)

    features = 32
    n_coefficients = 16
    N, H, W = 2, 16, 16

    raw = make_raw_params(k_params, features, n_coefficients)
    params = pack_params(raw, features, n_coefficients)

    gate = jax.random.normal(k_gate, (N, features, H, W), jnp.float32)
    skip = jax.random.normal(k_skip, (N, features, H, W), jnp.float32)

    out = attention_gate(gate, skip, params)          # (2, 32, 16, 16), NCHW
    jax.block_until_ready(out)

    assert out.shape == (N, features, H, W), out.shape
    assert bool(jnp.all(jnp.isfinite(out)))
    # psi is a sigmoid gate, so |out| <= |skip| elementwise.
    assert bool(jnp.all(jnp.abs(out) <= jnp.abs(skip) + 1e-5))

    # Cross-check against the pure-JAX reference of the PyTorch module.
    ref = attention_gate_reference(gate, skip, raw)
    max_err = float(jnp.max(jnp.abs(out - ref)))
    assert max_err < 5e-2, max_err

    print("KERNEL_OK")
</pallas_src>

<mosaic_0001>
module attributes {stable_mosaic.version = 11 : i64} {
  func.func @_attention_gate_kernel(%arg0: memref<64x256xf32, #tpu.memory_space<vmem>>, %arg1: memref<64x256xf32, #tpu.memory_space<vmem>>, %arg2: memref<32x64xf32, #tpu.memory_space<vmem>>, %arg3: memref<32x1xf32, #tpu.memory_space<vmem>>, %arg4: memref<32x1xf32, #tpu.memory_space<vmem>>, %arg5: memref<32x1xf32, #tpu.memory_space<vmem>>, %arg6: memref<16x1xf32, #tpu.memory_space<vmem>>, %arg7: memref<3xf32, #tpu.memory_space<smem>>, %arg8: memref<64x256xf32, #tpu.memory_space<vmem>>) attributes {dimension_semantics = [], scalar_prefetch = 0 : i64, scratch_operands = 0 : i64, tpu.core_type = #tpu.core_type<tc>} {
    %c0 = arith.constant 0 : index
    %c0_0 = arith.constant 0 : index
    %0 = vector.load %arg0[%c0, %c0_0] : memref<64x256xf32, #tpu.memory_space<vmem>>, vector<32x256xf32>
    %c32 = arith.constant 32 : index
    %c0_1 = arith.constant 0 : index
    %1 = vector.load %arg0[%c32, %c0_1] : memref<64x256xf32, #tpu.memory_space<vmem>>, vector<32x256xf32>
    %2 = tpu.concatenate %0, %1 in 1 : vector<32x256xf32>, vector<32x256xf32> -> vector<32x512xf32>
    %c0_2 = arith.constant 0 : index
    %c0_3 = arith.constant 0 : index
    %3 = vector.load %arg1[%c0_2, %c0_3] : memref<64x256xf32, #tpu.memory_space<vmem>>, vector<32x256xf32>
    %c32_4 = arith.constant 32 : index
    %c0_5 = arith.constant 0 : index
    %4 = vector.load %arg1[%c32_4, %c0_5] : memref<64x256xf32, #tpu.memory_space<vmem>>, vector<32x256xf32>
    %5 = tpu.concatenate %3, %4 in 1 : vector<32x256xf32>, vector<32x256xf32> -> vector<32x512xf32>
    %6 = tpu.concatenate %2, %5 in 0 : vector<32x512xf32>, vector<32x512xf32> -> vector<64x512xf32>
    %c0_6 = arith.constant 0 : index
    %c0_7 = arith.constant 0 : index
    %7 = vector.load %arg2[%c0_6, %c0_7] : memref<32x64xf32, #tpu.memory_space<vmem>>, vector<32x64xf32>
    %cst = arith.constant dense<0.000000e+00> : vector<32x512xf32>
    %8 = tpu.matmul %7, %6, %cst {dimension_numbers = #tpu.dot_dimension_numbers<[1], [0], [0], [1], [0, 0, 1, 1], [], []>} : vector<32x64xf32>, vector<64x512xf32>, vector<32x512xf32> -> vector<32x512xf32>
    %c0_8 = arith.constant 0 : index
    %c0_9 = arith.constant 0 : index
    %9 = vector.load %arg3[%c0_8, %c0_9] : memref<32x1xf32, #tpu.memory_space<vmem>>, vector<32x1xf32>
    %10 = vector.broadcast %9 : vector<32x1xf32> to vector<32x512xf32>
    %11 = arith.addf %8, %10 : vector<32x512xf32>
    %cst_10 = arith.constant dense<0.000000e+00> : vector<32xf32>
    %12 = vector.multi_reduction <add>, %11, %cst_10 [1] : vector<32x512xf32> to vector<32xf32>
    %13 = vector.shape_cast %12 : vector<32xf32> to vector<32x1xf32>
    %cst_11 = arith.constant 0.001953125 : f32
    %14 = vector.broadcast %cst_11 : f32 to vector<32x1xf32>
    %15 = arith.mulf %13, %14 : vector<32x1xf32>
    %16 = vector.broadcast %15 : vector<32x1xf32> to vector<32x512xf32>
    %17 = arith.subf %11, %16 : vector<32x512xf32>
    %18 = arith.mulf %17, %17 : vector<32x512xf32>
    %cst_12 = arith.constant dense<0.000000e+00> : vector<32xf32>
    %19 = vector.multi_reduction <add>, %18, %cst_12 [1] : vector<32x512xf32> to vector<32xf32>
    %20 = vector.shape_cast %19 : vector<32xf32> to vector<32x1xf32>
    %cst_13 = arith.constant 0.001953125 : f32
    %21 = vector.broadcast %cst_13 : f32 to vector<32x1xf32>
    %22 = arith.mulf %20, %21 : vector<32x1xf32>
    %cst_14 = arith.constant 9.99999974E-6 : f32
    %23 = vector.broadcast %cst_14 : f32 to vector<32x1xf32>
    %24 = arith.addf %22, %23 : vector<32x1xf32>
    %25 = math.rsqrt %24 : vector<32x1xf32>
    %26 = vector.broadcast %25 : vector<32x1xf32> to vector<32x512xf32>
    %27 = arith.mulf %17, %26 : vector<32x512xf32>
    %c0_15 = arith.constant 0 : index
    %c0_16 = arith.constant 0 : index
    %28 = vector.load %arg4[%c0_15, %c0_16] : memref<32x1xf32, #tpu.memory_space<vmem>>, vector<32x1xf32>
    %29 = vector.broadcast %28 : vector<32x1xf32> to vector<32x512xf32>
    %30 = arith.mulf %27, %29 : vector<32x512xf32>
    %c0_17 = arith.constant 0 : index
    %c0_18 = arith.constant 0 : index
    %31 = vector.load %arg5[%c0_17, %c0_18] : memref<32x1xf32, #tpu.memory_space<vmem>>, vector<32x1xf32>
    %32 = vector.broadcast %31 : vector<32x1xf32> to vector<32x512xf32>
    %33 = arith.addf %30, %32 : vector<32x512xf32>
    %34 = vector.extract_strided_slice %33 {offsets = [0, 0], sizes = [16, 512], strides = [1, 1]} : vector<32x512xf32> to vector<16x512xf32>
    %35 = vector.extract_strided_slice %33 {offsets = [16, 0], sizes = [16, 512], strides = [1, 1]} : vector<32x512xf32> to vector<16x512xf32>
    %36 = arith.addf %34, %35 : vector<16x512xf32>
    %cst_19 = arith.constant 0.000000e+00 : f32
    %37 = vector.broadcast %cst_19 : f32 to vector<16x512xf32>
    %38 = arith.maximumf %36, %37 : vector<16x512xf32>
    %c0_20 = arith.constant 0 : index
    %c0_21 = arith.constant 0 : index
    %39 = vector.load %arg6[%c0_20, %c0_21] : memref<16x1xf32, #tpu.memory_space<vmem>>, vector<16x1xf32>
    %40 = vector.broadcast %39 : vector<16x1xf32> to vector<16x512xf32>
    %41 = arith.mulf %38, %40 : vector<16x512xf32>
    %cst_22 = arith.constant dense<0.000000e+00> : vector<512xf32>
    %42 = vector.multi_reduction <add>, %41, %cst_22 [0] : vector<16x512xf32> to vector<512xf32>
    %43 = vector.shape_cast %42 : vector<512xf32> to vector<1x512xf32>
    %c0_23 = arith.constant 0 : index
    %44 = memref.load %arg7[%c0_23] : memref<3xf32, #tpu.memory_space<smem>>
    %45 = vector.broadcast %44 : f32 to vector<1x512xf32>
    %46 = arith.addf %43, %45 : vector<1x512xf32>
    %cst_24 = arith.constant dense<0.000000e+00> : vector<1xf32>
    %47 = vector.multi_reduction <add>, %46, %cst_24 [1] : vector<1x512xf32> to vector<1xf32>
    %48 = vector.shape_cast %47 : vector<1xf32> to vector<1x1xf32>
    %cst_25 = arith.constant 0.001953125 : f32
    %49 = vector.broadcast %cst_25 : f32 to vector<1x1xf32>
    %50 = arith.mulf %48, %49 : vector<1x1xf32>
    %51 = vector.broadcast %50 : vector<1x1xf32> to vector<1x512xf32>
    %52 = arith.subf %46, %51 : vector<1x512xf32>
    %53 = arith.mulf %52, %52 : vector<1x512xf32>
    %cst_26 = arith.constant dense<0.000000e+00> : vector<1xf32>
    %54 = vector.multi_reduction <add>, %53, %cst_26 [1] : vector<1x512xf32> to vector<1xf32>
    %55 = vector.shape_cast %54 : vector<1xf32> to vector<1x1xf32>
    %cst_27 = arith.constant 0.001953125 : f32
    %56 = vector.broadcast %cst_27 : f32 to vector<1x1xf32>
    %57 = arith.mulf %55, %56 : vector<1x1xf32>
    %cst_28 = arith.constant 9.99999974E-6 : f32
    %58 = vector.broadcast %cst_28 : f32 to vector<1x1xf32>
    %59 = arith.addf %57, %58 : vector<1x1xf32>
    %60 = math.rsqrt %59 : vector<1x1xf32>
    %61 = vector.broadcast %60 : vector<1x1xf32> to vector<1x512xf32>
    %62 = arith.mulf %52, %61 : vector<1x512xf32>
    %c1 = arith.constant 1 : index
    %63 = memref.load %arg7[%c1] : memref<3xf32, #tpu.memory_space<smem>>
    %64 = vector.broadcast %63 : f32 to vector<1x512xf32>
    %65 = arith.mulf %62, %64 : vector<1x512xf32>
    %c2 = arith.constant 2 : index
    %66 = memref.load %arg7[%c2] : memref<3xf32, #tpu.memory_space<smem>>
    %67 = vector.broadcast %66 : f32 to vector<1x512xf32>
    %68 = arith.addf %65, %67 : vector<1x512xf32>
    %cst_29 = arith.constant 0.000000e+00 : f32
    %69 = vector.broadcast %cst_29 : f32 to vector<1x512xf32>
    %70 = arith.subf %69, %68 : vector<1x512xf32>
    %71 = math.exp %70 : vector<1x512xf32>
    %cst_30 = arith.constant 1.000000e+00 : f32
    %72 = vector.broadcast %cst_30 : f32 to vector<1x512xf32>
    %73 = arith.addf %72, %71 : vector<1x512xf32>
    %cst_31 = arith.constant 1.000000e+00 : f32
    %74 = vector.broadcast %cst_31 : f32 to vector<1x512xf32>
    %75 = arith.divf %74, %73 : vector<1x512xf32>
    %c0_32 = arith.constant 0 : index
    %c0_33 = arith.constant 0 : index
    %76 = vector.load %arg1[%c0_32, %c0_33] : memref<64x256xf32, #tpu.memory_space<vmem>>, vector<32x256xf32>
    %77 = vector.extract_strided_slice %75 {offsets = [0, 0], sizes = [1, 256], strides = [1, 1]} : vector<1x512xf32> to vector<1x256xf32>
    %78 = vector.broadcast %77 : vector<1x256xf32> to vector<32x256xf32>
    %79 = arith.mulf %76, %78 : vector<32x256xf32>
    %c0_34 = arith.constant 0 : index
    %c0_35 = arith.constant 0 : index
    %80 = vector.load %arg8[%c0_34, %c0_35] : memref<64x256xf32, #tpu.memory_space<vmem>>, vector<32x256xf32>
    tpu.vector_store %arg8[%c0_34, %c0_35], %79 {strides = array<i32>} : memref<64x256xf32, #tpu.memory_space<vmem>>, vector<32x256xf32>,
    %c32_36 = arith.constant 32 : index
    %c0_37 = arith.constant 0 : index
    %81 = vector.load %arg1[%c32_36, %c0_37] : memref<64x256xf32, #tpu.memory_space<vmem>>, vector<32x256xf32>
    %82 = vector.extract_strided_slice %75 {offsets = [0, 256], sizes = [1, 256], strides = [1, 1]} : vector<1x512xf32> to vector<1x256xf32>
    %83 = vector.broadcast %82 : vector<1x256xf32> to vector<32x256xf32>
    %84 = arith.mulf %81, %83 : vector<32x256xf32>
    %c32_38 = arith.constant 32 : index
    %c0_39 = arith.constant 0 : index
    %85 = vector.load %arg8[%c32_38, %c0_39] : memref<64x256xf32, #tpu.memory_space<vmem>>, vector<32x256xf32>
    tpu.vector_store %arg8[%c32_38, %c0_39], %84 {strides = array<i32>} : memref<64x256xf32, #tpu.memory_space<vmem>>, vector<32x256xf32>,
    return
  }
}

</mosaic_0001>

<bundles_post_ra>
// kernel: attention_gate.1
= control target key start
LH: loop header
LB: loop body
LE: loop exit
PB: predicated region body
PF: predicated region fallthrough
CT: control target
= control target key end

     0   :  { %13 = vsyncpa [#allocation3], 0  ;;  %s1116_s0 = inlined_call_operand.vmem [shape: f32[64,256], index: 0, kind: input, shape index: {}]   ;;  %s1117_s1 = inlined_call_operand.vmem [shape: f32[64,256], index: 1, kind: input, shape index: {}]   ;;  %s1118_s2 = inlined_call_operand.vmem [shape: f32[32,64], index: 2, kind: input, shape index: {}]   ;;  %s1119_s3 = inlined_call_operand.vmem [shape: f32[32,1], index: 3, kind: input, shape index: {}]   ;;  %s1120_s4 = inlined_call_operand.vmem [shape: f32[32,1], index: 4, kind: input, shape index: {}]   ;;  %s1121_s5 = inlined_call_operand.vmem [shape: f32[32,1], index: 5, kind: input, shape index: {}]   ;;  %s1122_s6 = inlined_call_operand.vmem [shape: f32[16,1], index: 6, kind: input, shape index: {}]   ;;  %s1123_s7 = inlined_call_operand.vmem [shape: f32[3], index: 7, kind: input, shape index: {}]   ;;  %s1124_s8 = inlined_call_operand.vmem [shape: f32[64,256], index: 8, kind: output, shape index: {}]  }
   0x1   :  { %s34_s29 = sshll.u32 %s1123_s7, 4  ;;  %s35_s29 = int_to_ptr.vmem [resolvable:$true] %s34_s29 }
   0x2   :  { %s695_s30 = scalar_lea.vmem %s35_s29, 16  ;;  %p700_p1 = scmp.lt.s32.totalorder %s35_s29, %s35_s29 }
   0x3   :  { %p696_p0 = scmp.ne.s32.totalorder %s35_s29, %s695_s30  ;;  %p701_p2 = scmp.lt.s32.totalorder %s695_s30, %s695_s30 }
   0x5   :  { %p702_p3 = por %p701_p2, %p700_p1 }
   0x7   :  { %p703_p4 = pnand %p702_p3, %p696_p0 }
   0x9   :  { %706 = shalt.err (!%p703_p4)
}
   0xa   :  { %s709_s9 = smov [#allocation2]  }
   0xb   :  { %37 = dma.vmem_to_smem %s35_s29, 16, %s709_s9, [#allocation3]  }
   0xc   :  { %707 = dma.done.wait [#allocation3], 16  }
   0xd   :  { %708 = vsyncadd [#allocation3], 4294967280 }
   0xe   :  { %41 = sfence }
   0xf   :  { %v763_v0 = vld [vmem:[%s1117_s1 + $0x38] sm:$0xff]  ;;  %v773_v2 = vld [vmem:[%s1117_s1 + $0x30] sm:$0xff]  ;;  %v785_v4 = vld [vmem:[%s1117_s1 + $0x28] sm:$0xff]  ;;  %vm102_vm0 = vcmask 523264   ;;  %v710_v33 = vmov 0.0   ;;  %v711_v37 = vmov 0  }
  0x10   :  { %v768_v1 = vld [vmem:[%s1117_s1 + $0x78] sm:$0xff]  ;;  %131 = vmatprep.subr.mxu0 %v763_v0  ;;  %v780_v3 = vld [vmem:[%s1117_s1 + $0x70] sm:$0xff]  ;;  %v790_v5 = vld [vmem:[%s1117_s1 + $0x68] sm:$0xff]  ;;  %179 = vmatprep.mubr.f32.mxu0 %v710_v33  ;;  %s663_s10 = sld [smem:[#allocation2 + $0x2]] }
  0x11   :  { %220 = vmatprep.subr.mxu1 %v768_v1  ;;  %132 = vmatpush1.msra.mxu0 %v773_v2  ;;  %v797_v6 = vld [vmem:[%s1117_s1 + $0x20] sm:$0xff]  ;;  %v807_v8 = vld [vmem:[%s1117_s1 + $0x18] sm:$0xff]  ;;  %v819_v10 = vld [vmem:[%s1117_s1 + $0x10] sm:$0xff] }
  0x12   :  { %221 = vmatpush1.msra.mxu1 %v780_v3  ;;  %v802_v7 = vld [vmem:[%s1117_s1 + $0x60] sm:$0xff]  ;;  %133 = vmatprep.subr.mxu0 %v785_v4  ;;  %v814_v9 = vld [vmem:[%s1117_s1 + $0x58] sm:$0xff]  ;;  %v824_v11 = vld [vmem:[%s1117_s1 + $0x50] sm:$0xff] }
  0x13   :  { %222 = vmatprep.subr.mxu1 %v790_v5  ;;  %134 = vmatpush1.msra.mxu0 %v797_v6  ;;  %v831_v12 = vld [vmem:[%s1117_s1 + $0x8] sm:$0xff]  ;;  %v843_v14 = vld [vmem:[%s1117_s1] sm:$0xff]  ;;  %v49_v16 = vld [vmem:[%s1116_s0 + $0x38] sm:$0xff] }
  0x14   :  { %223 = vmatpush1.msra.mxu1 %v802_v7  ;;  %v836_v13 = vld [vmem:[%s1117_s1 + $0x48] sm:$0xff]  ;;  %135 = vmatprep.subr.mxu0 %v807_v8  ;;  %v848_v15 = vld [vmem:[%s1117_s1 + $0x40] sm:$0xff]  ;;  %v57_v17 = vld [vmem:[%s1116_s0 + $0x78] sm:$0xff] }
  0x15   :  { %224 = vmatprep.subr.mxu1 %v814_v9  ;;  %136 = vmatpush1.msra.mxu0 %v819_v10  ;;  %v48_v18 = vld [vmem:[%s1116_s0 + $0x30] sm:$0xff]  ;;  %v47_v20 = vld [vmem:[%s1116_s0 + $0x28] sm:$0xff]  ;;  %v46_v22 = vld [vmem:[%s1116_s0 + $0x20] sm:$0xff] }
  0x16   :  { %225 = vmatpush1.msra.mxu1 %v824_v11  ;;  %137 = vmatprep.subr.mxu0 %v831_v12  ;;  %v56_v19 = vld [vmem:[%s1116_s0 + $0x70] sm:$0xff]  ;;  %v55_v21 = vld [vmem:[%s1116_s0 + $0x68] sm:$0xff]  ;;  %v54_v23 = vld [vmem:[%s1116_s0 + $0x60] sm:$0xff] }
  0x17   :  { %226 = vmatprep.subr.mxu1 %v836_v13  ;;  %138 = vmatpush1.msra.mxu0 %v843_v14  ;;  %v45_v24 = vld [vmem:[%s1116_s0 + $0x18] sm:$0xff]  ;;  %v44_v26 = vld [vmem:[%s1116_s0 + $0x10] sm:$0xff]  ;;  %v43_v28 = vld [vmem:[%s1116_s0 + $0x8] sm:$0xff] }
  0x18   :  { %227 = vmatpush1.msra.mxu1 %v848_v15  ;;  %139 = vmatprep.subr.mxu0 %v49_v16  ;;  %v53_v25 = vld [vmem:[%s1116_s0 + $0x58] sm:$0xff]  ;;  %v52_v27 = vld [vmem:[%s1116_s0 + $0x50] sm:$0xff]  ;;  %v51_v29 = vld [vmem:[%s1116_s0 + $0x48] sm:$0xff] }
  0x19   :  { %228 = vmatprep.subr.mxu1 %v57_v17  ;;  %140 = vmatpush1.msra.mxu0 %v48_v18  ;;  %v42_v30 = vld [vmem:[%s1116_s0] sm:$0xff]  ;;  %v80_v35 = vld [vmem:[%s1119_s3 + $0x10] sm:$0xff]  ;;  %v75_v36 = vld [vmem:[%s1118_s2 + $0x8] sm:$0xff] }
  0x1a   :  { %229 = vmatpush1.msra.mxu1 %v56_v19  ;;  %141 = vmatprep.subr.mxu0 %v47_v20  ;;  %v50_v31 = vld [vmem:[%s1116_s0 + $0x40] sm:$0xff]  ;;  %v79_v38 = vld [vmem:[%s1119_s3 + $0x8] sm:$0xff]  ;;  %v81_v39 = vld [vmem:[%s1119_s3 + $0x18] sm:$0xff] }
  0x1b   :  { %230 = vmatprep.subr.mxu1 %v55_v21  ;;  %142 = vmatpush1.msra.mxu0 %v46_v22  ;;  %v74_v32 = vld [vmem:[%s1118_s2] sm:$0xff]  ;;  %v76_v40 = vld [vmem:[%s1118_s2 + $0x10] sm:$0xff]  ;;  %v77_v41 = vld [vmem:[%s1118_s2 + $0x18] sm:$0xff] }
  0x1c   :  { %231 = vmatpush1.msra.mxu1 %v54_v23  ;;  %143 = vmatprep.subr.mxu0 %v45_v24  ;;  %v78_v34 = vld [vmem:[%s1119_s3] sm:$0xff] }
  0x1d   :  { %232 = vmatprep.subr.mxu1 %v53_v25  ;;  %144 = vmatpush1.msra.mxu0 %v44_v26 }
  0x1e   :  { %233 = vmatpush1.msra.mxu1 %v52_v27  ;;  %145 = vmatprep.subr.mxu0 %v43_v28 }
  0x1f   :  { %234 = vmatprep.subr.mxu1 %v51_v29  ;;  %146 = vmatpush1.msra.mxu0 %v42_v30 }
  0x20   :  { %235 = vmatpush1.msra.mxu1 %v50_v31  ;;  %268 = vmatprep.mubr.f32.mxu1 %v710_v33 }
  0x21   :  { %654 = vmatmul.mubr.msk.f32.vlgmr.msra.gmra.mxu0 %vm102_vm0, %v74_v32  ;;  %658 = vmatmul.mubr.msk.f32.vlgmr.msra.gmra.mxu1 %vm102_vm0, %v74_v32 }
  0x22   :  { %185 = vmatprep.mubr.f32.mxu0 %v710_v33  ;;  %274 = vmatprep.mubr.f32.mxu1 %v710_v33 }
  0x23   :  { %667 = vset.pattern.permute.xlu0 %v711_v37  ;;  %668 = vset.pattern.permute.xlu1 %v711_v37 }
  0x24   :  { %84 = vperm.xlu0 %667, %v78_v34   ;;  %94 = vperm.xlu1 %668, %v80_v35  }
  0x25   :  { %655 = vmatmul.mubr.msk.f32.gmra.mxu0 %vm102_vm0, %v75_v36  ;;  %659 = vmatmul.mubr.msk.f32.gmra.mxu1 %vm102_vm0, %v75_v36 }
  0x26   :  { %191 = vmatprep.mubr.f32.mxu0 %v710_v33  ;;  %280 = vmatprep.mubr.f32.mxu1 %v710_v33 }
  0x28   :  { %89 = vperm.xlu0 %667, %v79_v38   ;;  %99 = vperm.xlu1 %668, %v81_v39  }
  0x29   :  { %656 = vmatmul.mubr.msk.f32.gmra.mxu0 %vm102_vm0, %v76_v40  ;;  %660 = vmatmul.mubr.msk.f32.gmra.mxu1 %vm102_vm0, %v76_v40 }
  0x2a   :  { %197 = vmatprep.mubr.f32.mxu0 %v710_v33  ;;  %286 = vmatprep.mubr.f32.mxu1 %v710_v33 }
  0x2d   :  { %657 = vmatmul.mubr.msk.f32.gmra.mxu0 %vm102_vm0, %v77_v41  ;;  %661 = vmatmul.mubr.msk.f32.gmra.mxu1 %vm102_vm0, %v77_v41 }
  0x9f   :  { %v85_v42 = vpop.permute.xlu0 %84  ;;  %v95_v58 = vpop.permute.xlu1 %94 }
  0xa3   :  { %v90_v50 = vpop.permute.xlu0 %89  ;;  %v100_v29 = vpop.permute.xlu1 %99 }
  0xe1   :  { %v181_v43 = vpop.f32.mrf.mxu0  ;;  %v270_v44 = vpop.f32.mrf.mxu1 }
  0xe2   :  { %v182_v47 = vadd.f32 %v181_v43, %v85_v42  ;;  %v271_v48 = vadd.f32 %v270_v44, %v85_v42  ;;  %v399_v43 = vld [vmem:[%s1120_s4 + $0x10] sm:$0xff]  ;;  %v400_v44 = vld [vmem:[%s1120_s4 + $0x18] sm:$0xff] }
  0xe3   :  { %v183_v45 = vpop.f32.mrf.mxu0  ;;  %v272_v46 = vpop.f32.mrf.mxu1 }
  0xe4   :  { %v184_v49 = vadd.f32 %v183_v45, %v85_v42  ;;  %v273_v56 = vadd.f32 %v272_v46, %v85_v42  ;;  %v397_v42 = vld [vmem:[%s1120_s4] sm:$0xff]  ;;  %v438_v45 = vld [vmem:[%s1121_s5 + $0x8] sm:$0xff] }
  0xe5   :  { %v187_v51 = vpop.f32.mrf.mxu0  ;;  %v276_v52 = vpop.f32.mrf.mxu1  ;;  %v398_v46 = vld [vmem:[%s1120_s4 + $0x8] sm:$0xff] }
  0xe6   :  { %v293_v53 = vadd.f32 %v184_v49, %v182_v47  ;;  %v188_v57 = vadd.f32 %v187_v51, %v90_v50  ;;  %v277_v63 = vadd.f32 %v276_v52, %v90_v50 }
  0xe7   :  { %v189_v54 = vpop.f32.mrf.mxu0  ;;  %v278_v55 = vpop.f32.mrf.mxu1 }
  0xe8   :  { %v190_v59 = vadd.f32 %v189_v54, %v90_v50  ;;  %v294_v60 = vadd.f32 %v293_v53, %v271_v48  ;;  %v279_v20 = vadd.f32 %v278_v55, %v90_v50  ;;  %v437_v50 = vld [vmem:[%s1121_s5] sm:$0xff] }
  0xe9   :  { %v193_v61 = vpop.f32.mrf.mxu0  ;;  %v282_v62 = vpop.f32.mrf.mxu1 }
  0xea   :  { %v298_v16 = vadd.f32 %v190_v59, %v188_v57  ;;  %v295_v17 = vadd.f32 %v294_v60, %v273_v56  ;;  %v194_v21 = vadd.f32 %v193_v61, %v95_v58  ;;  %v283_v26 = vadd.f32 %v282_v62, %v95_v58 }
  0xeb   :  { %v195_v18 = vpop.f32.mrf.mxu0  ;;  %v284_v19 = vpop.f32.mrf.mxu1 }
  0xec   :  { %v196_v22 = vadd.f32 %v195_v18, %v95_v58  ;;  %296 = vadd.xlane.f32.xlu0 %v295_v17  ;;  %v299_v23 = vadd.f32 %v298_v16, %v277_v63  ;;  %v285_v31 = vadd.f32 %v284_v19, %v95_v58 }
  0xed   :  { %v199_v24 = vpop.f32.mrf.mxu0  ;;  %v288_v25 = vpop.f32.mrf.mxu1 }
  0xee   :  { %v303_v27 = vadd.f32 %v196_v22, %v194_v21  ;;  %v300_v28 = vadd.f32 %v299_v23, %v279_v20  ;;  %v200_v32 = vadd.f32 %v199_v24, %v100_v29  ;;  %v289_v36 = vadd.f32 %v288_v25, %v100_v29 }
  0xef   :  { %v201_v30 = vpop.f32.mrf.mxu0  ;;  %v290_v35 = vpop.f32.mrf.mxu1 }
  0xf0   :  { %v202_v33 = vadd.f32 %v201_v30, %v100_v29  ;;  %301 = vadd.xlane.f32.xlu1 %v300_v28  ;;  %v304_v34 = vadd.f32 %v303_v27, %v283_v26  ;;  %v291_v39 = vadd.f32 %v290_v35, %v100_v29 }
  0xf2   :  { %v308_v37 = vadd.f32 %v202_v33, %v200_v32  ;;  %v305_v38 = vadd.f32 %v304_v34, %v285_v31 }
  0xf4   :  { %306 = vadd.xlane.f32.xlu0 %v305_v38  ;;  %v309_v40 = vadd.f32 %v308_v37, %v289_v36 }
  0xf6   :  { %v310_v41 = vadd.f32 %v309_v40, %v291_v39 }
  0xf8   :  { %311 = vadd.xlane.f32.xlu0 %v310_v41 }
 0x101   :  { %403 = vperm.xlu1 %668, %v397_v42  }
 0x105   :  { %413 = vperm.xlu1 %668, %v399_v43  }
 0x109   :  { %418 = vperm.xlu1 %668, %v400_v44  }
 0x10d   :  { %448 = vperm.xlu1 %668, %v438_v45  }
 0x10e   :  { %408 = vperm.xlu0 %667, %v398_v46  }
 0x112   :  { %443 = vperm.xlu0 %667, %v437_v50  }
 0x175   :  { %v297_v51 = vpop.xlane.xlu0 %296 }
 0x176   :  { %v313_v52 = vmul.f32 0.001953125, %v297_v51 }
 0x178   :  { %v954_v53 = vsub.f32 %v182_v47, %v313_v52  ;;  %v956_v54 = vsub.f32 %v184_v49, %v313_v52  ;;  %v958_v55 = vsub.f32 %v271_v48, %v313_v52  ;;  %v960_v60 = vsub.f32 %v273_v56, %v313_v52 }
 0x179   :  { %v302_v58 = vpop.xlane.xlu1 %301 }
 0x17a   :  { %v314_v61 = vmul.f32 0.001953125, %v302_v58  ;;  %v333_v62 = vmul.f32 %v954_v53, %v954_v53  ;;  %v334_v16 = vmul.f32 %v956_v54, %v956_v54  ;;  %v335_v17 = vmul.f32 %v958_v55, %v958_v55 }
 0x17b   :  { %v336_v56 = vmul.f32 %v960_v60, %v960_v60 }
 0x17c   :  { %v968_v18 = vsub.f32 %v188_v57, %v314_v61  ;;  %v970_v47 = vsub.f32 %v190_v59, %v314_v61  ;;  %v349_v49 = vadd.f32 %v334_v16, %v333_v62  ;;  %v972_v48 = vsub.f32 %v277_v63, %v314_v61  ;;  %v494_v16 = vld [vmem:[%s1122_s6 + $0x8] sm:$0xff] }
 0x17d   :  { %v307_v19 = vpop.xlane.xlu0 %306  ;;  %v976_v23 = vsub.f32 %v279_v20, %v314_v61 }
 0x17e   :  { %v315_v24 = vmul.f32 0.001953125, %v307_v19  ;;  %v350_v25 = vadd.f32 %v349_v49, %v335_v17  ;;  %v337_v27 = vmul.f32 %v968_v18, %v968_v18  ;;  %v338_v57 = vmul.f32 %v970_v47, %v970_v47  ;;  %v439_v17 = vld [vmem:[%s1121_s5 + $0x10] sm:$0xff]  ;;  %v493_v49 = vld [vmem:[%s1122_s6] sm:$0xff]  ;;  %v404_v19 = vpop.permute.xlu1 %403  ;;  %s662_s6 = sld [smem:[#allocation2 + $0x1]] }
 0x17f   :  { %v339_v59 = vmul.f32 %v972_v48, %v972_v48  ;;  %v340_v20 = vmul.f32 %v976_v23, %v976_v23 }
 0x180   :  { %v984_v28 = vsub.f32 %v194_v21, %v315_v24  ;;  %v986_v63 = vsub.f32 %v196_v22, %v315_v24  ;;  %v351_v29 = vadd.f32 %v350_v25, %v336_v56  ;;  %v354_v30 = vadd.f32 %v338_v57, %v337_v27 }
 0x181   :  { %v312_v34 = vpop.xlane.xlu0 %311  ;;  %v990_v35 = vsub.f32 %v283_v26, %v315_v24  ;;  %v992_v37 = vsub.f32 %v285_v31, %v315_v24 }
 0x182   :  { %v316_v38 = vmul.f32 0.001953125, %v312_v34  ;;  %352 = vadd.xlane.f32.xlu1 %v351_v29  ;;  %v355_v40 = vadd.f32 %v354_v30, %v339_v59  ;;  %v341_v41 = vmul.f32 %v984_v28, %v984_v28  ;;  %v342_v21 = vmul.f32 %v986_v63, %v986_v63  ;;  %v414_v56 = vpop.permute.xlu1 %413 }
 0x183   :  { %v343_v22 = vmul.f32 %v990_v35, %v990_v35  ;;  %v344_v31 = vmul.f32 %v992_v37, %v992_v37 }
 0x184   :  { %v1000_v42 = vsub.f32 %v200_v32, %v316_v38  ;;  %v1002_v43 = vsub.f32 %v202_v33, %v316_v38  ;;  %v356_v26 = vadd.f32 %v355_v40, %v340_v20  ;;  %v359_v44 = vadd.f32 %v342_v21, %v341_v41 }
 0x185   :  { %v1006_v45 = vsub.f32 %v289_v36, %v316_v38  ;;  %v1008_v50 = vsub.f32 %v291_v39, %v316_v38  ;;  %v440_v39 = vld [vmem:[%s1121_s5 + $0x18] sm:$0xff]  ;;  %s541_s5 = sld [smem:[#allocation2]] }
 0x186   :  { %357 = vadd.xlane.f32.xlu0 %v356_v26  ;;  %v360_v46 = vadd.f32 %v359_v44, %v343_v22  ;;  %v345_v51 = vmul.f32 %v1000_v42, %v1000_v42  ;;  %v346_v32 = vmul.f32 %v1002_v43, %v1002_v43  ;;  %v1030_v24 = vpop.permute.xlu1 %418 }
 0x187   :  { %v347_v33 = vmul.f32 %v1006_v45, %v1006_v45  ;;  %v348_v36 = vmul.f32 %v1008_v50, %v1008_v50 }
 0x188   :  { %v361_v52 = vadd.f32 %v360_v46, %v344_v31  ;;  %v364_v58 = vadd.f32 %v346_v32, %v345_v51 }
 0x189   :  { %v409_v25 = vpop.permute.xlu0 %408 }
 0x18a   :  { %362 = vadd.xlane.f32.xlu1 %v361_v52  ;;  %v365_v61 = vadd.f32 %v364_v58, %v347_v33  ;;  %v449_v27 = vpop.permute.xlu1 %448 }
 0x18c   :  { %v366_v62 = vadd.f32 %v365_v61, %v348_v36 }
 0x18d   :  { %v444_v57 = vpop.permute.xlu0 %443 }
 0x18e   :  { %367 = vadd.xlane.f32.xlu0 %v366_v62 }
 0x19b   :  { %458 = vperm.xlu1 %668, %v440_v39  }
 0x19f   :  { %502 = vperm.xlu1 %668, %v494_v16  }
 0x1a4   :  { %453 = vperm.xlu0 %667, %v439_v17  }
 0x1a8   :  { %497 = vperm.xlu0 %667, %v493_v49  }
 0x20b   :  { %v353_v59 = vpop.xlane.xlu1 %352 }
 0x20c   :  { %v369_v29 = vmul.f32 0.001953125, %v353_v59 }
 0x20e   :  { %v373_v30 = vadd.f32 1e-05, %v369_v29 }
 0x20f   :  { %v358_v34 = vpop.xlane.xlu0 %357 }
 0x210   :  { %669 = vrsqrt.f32 %v373_v30  ;;  %v370_v20 = vmul.f32 0.001953125, %v358_v34 }
 0x212   :  { %v374_v38 = vadd.f32 1e-05, %v370_v20 }
 0x213   :  { %v363_v40 = vpop.xlane.xlu1 %362 }
 0x214   :  { %671 = vrsqrt.f32 %v374_v38  ;;  %v371_v41 = vmul.f32 0.001953125, %v363_v40 }
 0x216   :  { %v375_v21 = vadd.f32 1e-05, %v371_v41 }
 0x217   :  { %v368_v22 = vpop.xlane.xlu0 %367 }
 0x218   :  { %673 = vrsqrt.f32 %v375_v21  ;;  %v372_v26 = vmul.f32 0.001953125, %v368_v22 }
 0x21a   :  { %v376_v44 = vadd.f32 1e-05, %v372_v26 }
 0x21c   :  { %675 = vrsqrt.f32 %v376_v44 }
 0x21d   :  { %v670_v31 = vpop.eup %669 }
 0x21e   :  { %v381_v46 = vmul.f32 %v670_v31, %v954_v53  ;;  %v382_v51 = vmul.f32 %v670_v31, %v956_v54  ;;  %v383_v32 = vmul.f32 %v670_v31, %v958_v55  ;;  %v384_v52 = vmul.f32 %v670_v31, %v960_v60 }
 0x220   :  { %v421_v58 = vmul.f32 %v404_v19, %v381_v46  ;;  %v422_v36 = vmul.f32 %v404_v19, %v382_v51  ;;  %v423_v61 = vmul.f32 %v404_v19, %v383_v32  ;;  %v424_v62 = vmul.f32 %v404_v19, %v384_v52 }
 0x221   :  { %v672_v33 = vpop.eup %671 }
 0x222   :  { %v385_v39 = vmul.f32 %v672_v33, %v968_v18  ;;  %v386_v16 = vmul.f32 %v672_v33, %v970_v47  ;;  %v387_v17 = vmul.f32 %v672_v33, %v972_v48  ;;  %v388_v49 = vmul.f32 %v672_v33, %v976_v23 }
 0x223   :  { %v461_v30 = vadd.f32 %v444_v57, %v421_v58  ;;  %v462_v60 = vadd.f32 %v444_v57, %v422_v36  ;;  %v463_v34 = vadd.f32 %v444_v57, %v423_v61  ;;  %v464_v20 = vadd.f32 %v444_v57, %v424_v62 }
 0x224   :  { %v425_v53 = vmul.f32 %v409_v25, %v385_v39  ;;  %v426_v59 = vmul.f32 %v409_v25, %v386_v16  ;;  %v427_v54 = vmul.f32 %v409_v25, %v387_v17  ;;  %v428_v29 = vmul.f32 %v409_v25, %v388_v49 }
 0x225   :  { %v674_v55 = vpop.eup %673 }
 0x226   :  { %v389_v38 = vmul.f32 %v674_v55, %v984_v28  ;;  %v390_v19 = vmul.f32 %v674_v55, %v986_v63  ;;  %v391_v18 = vmul.f32 %v674_v55, %v990_v35  ;;  %v392_v47 = vmul.f32 %v674_v55, %v992_v37  ;;  %v454_v35 = vpop.permute.xlu0 %453 }
 0x227   :  { %v465_v48 = vadd.f32 %v449_v27, %v425_v53  ;;  %v466_v40 = vadd.f32 %v449_v27, %v426_v59  ;;  %v467_v23 = vadd.f32 %v449_v27, %v427_v54  ;;  %v468_v41 = vadd.f32 %v449_v27, %v428_v29 }
 0x228   :  { %v429_v22 = vmul.f32 %v414_v56, %v389_v38  ;;  %v430_v25 = vmul.f32 %v414_v56, %v390_v19  ;;  %v431_v26 = vmul.f32 %v414_v56, %v391_v18  ;;  %v432_v44 = vmul.f32 %v414_v56, %v392_v47 }
 0x229   :  { %v676_v21 = vpop.eup %675 }
 0x22a   :  { %v393_v31 = vmul.f32 %v676_v21, %v1000_v42  ;;  %v394_v57 = vmul.f32 %v676_v21, %v1002_v43  ;;  %v395_v28 = vmul.f32 %v676_v21, %v1006_v45  ;;  %v396_v63 = vmul.f32 %v676_v21, %v1008_v50  ;;  %v459_v42 = vpop.permute.xlu1 %458 }
 0x22b   :  { %v469_v46 = vadd.f32 %v454_v35, %v429_v22  ;;  %v470_v37 = vadd.f32 %v454_v35, %v430_v25  ;;  %v471_v51 = vadd.f32 %v454_v35, %v431_v26  ;;  %v472_v32 = vadd.f32 %v454_v35, %v432_v44 }
 0x22c   :  { %v433_v27 = vmul.f32 %v1030_v24, %v393_v31  ;;  %v434_v52 = vmul.f32 %v1030_v24, %v394_v57  ;;  %v435_v33 = vmul.f32 %v1030_v24, %v395_v28  ;;  %v436_v56 = vmul.f32 %v1030_v24, %v396_v63 }
 0x22d   :  { %v477_v58 = vadd.f32 %v469_v46, %v461_v30  ;;  %v478_v43 = vadd.f32 %v470_v37, %v462_v60  ;;  %v479_v36 = vadd.f32 %v471_v51, %v463_v34  ;;  %v480_v45 = vadd.f32 %v472_v32, %v464_v20  ;;  %v498_v30 = vpop.permute.xlu0 %497 }
 0x22e   :  { %v473_v61 = vadd.f32 %v459_v42, %v433_v27  ;;  %v474_v50 = vadd.f32 %v459_v42, %v434_v52  ;;  %v475_v62 = vadd.f32 %v459_v42, %v435_v33  ;;  %v476_v39 = vadd.f32 %v459_v42, %v436_v56  ;;  %v503_v60 = vpop.permute.xlu1 %502 }
 0x22f   :  { %v485_v16 = vmax.f32 %v477_v58, 0.0  ;;  %v486_v17 = vmax.f32 %v478_v43, 0.0  ;;  %v487_v49 = vmax.f32 %v479_v36, 0.0  ;;  %v488_v53 = vmax.f32 %v480_v45, 0.0 }
 0x230   :  { %v481_v59 = vadd.f32 %v473_v61, %v465_v48  ;;  %v482_v54 = vadd.f32 %v474_v50, %v466_v40  ;;  %v483_v29 = vadd.f32 %v475_v62, %v467_v23  ;;  %v484_v55 = vadd.f32 %v476_v39, %v468_v41 }
 0x231   :  { %v505_v34 = vmul.f32 %v498_v30, %v485_v16  ;;  %v506_v20 = vmul.f32 %v498_v30, %v486_v17  ;;  %v507_v47 = vmul.f32 %v498_v30, %v487_v49  ;;  %v508_v21 = vmul.f32 %v498_v30, %v488_v53 }
 0x232   :  { %v489_v38 = vmax.f32 %v481_v59, 0.0  ;;  %v490_v19 = vmax.f32 %v482_v54, 0.0  ;;  %v491_v24 = vmax.f32 %v483_v29, 0.0  ;;  %v492_v18 = vmax.f32 %v484_v55, 0.0 }
 0x233   :  { %v542_v62 = vstv %s541_s5 }
 0x234   :  { %v509_v22 = vmul.f32 %v503_v60, %v489_v38  ;;  %v510_v25 = vmul.f32 %v503_v60, %v490_v19  ;;  %v511_v26 = vmul.f32 %v503_v60, %v491_v24  ;;  %v512_v44 = vmul.f32 %v503_v60, %v492_v18 }
 0x236   :  { %v513_v31 = vadd.f32 %v509_v22, %v505_v34  ;;  %v520_v57 = vadd.f32 %v510_v25, %v506_v20  ;;  %v527_v48 = vadd.f32 %v511_v26, %v507_v47  ;;  %v534_v40 = vadd.f32 %v512_v44, %v508_v21 }
 0x238   :  { %v514_v23 = vrot.slane %v513_v31, 4  ;;  %v521_v41 = vrot.slane %v520_v57, 4  ;;  %v528_v28 = vrot.slane %v527_v48, 4  ;;  %v535_v63 = vrot.slane %v534_v40, 4 }
 0x23a   :  { %v515_v35 = vadd.f32 %v514_v23, %v513_v31  ;;  %v522_v46 = vadd.f32 %v521_v41, %v520_v57  ;;  %v529_v37 = vadd.f32 %v528_v28, %v527_v48  ;;  %v536_v51 = vadd.f32 %v535_v63, %v534_v40 }
 0x23b   :  { %v574_v41 = vstv %s662_s6 }
 0x23c   :  { %v516_v32 = vrot.slane %v515_v35, 2  ;;  %v523_v27 = vrot.slane %v522_v46, 2  ;;  %v530_v52 = vrot.slane %v529_v37, 2  ;;  %v537_v33 = vrot.slane %v536_v51, 2 }
 0x23e   :  { %v517_v56 = vadd.f32 %v516_v32, %v515_v35  ;;  %v524_v42 = vadd.f32 %v523_v27, %v522_v46  ;;  %v531_v58 = vadd.f32 %v530_v52, %v529_v37  ;;  %v538_v43 = vadd.f32 %v537_v33, %v536_v51 }
 0x23f   :  { %v580_v37 = vstv %s663_s10 }
 0x240   :  { %v518_v36 = vrot.slane %v517_v56, 1  ;;  %v525_v45 = vrot.slane %v524_v42, 1  ;;  %v532_v61 = vrot.slane %v531_v58, 1  ;;  %v539_v50 = vrot.slane %v538_v43, 1 }
 0x242   :  { %v519_v39 = vadd.f32 %v518_v36, %v517_v56  ;;  %v526_v16 = vadd.f32 %v525_v45, %v524_v42  ;;  %v533_v17 = vadd.f32 %v532_v61, %v531_v58  ;;  %v540_v49 = vadd.f32 %v539_v50, %v538_v43 }
 0x244   :  { %v543_v53 = vadd.f32 %v542_v62, %v519_v39  ;;  %v544_v59 = vadd.f32 %v542_v62, %v526_v16  ;;  %v545_v54 = vadd.f32 %v542_v62, %v533_v17  ;;  %v546_v55 = vadd.f32 %v542_v62, %v540_v49 }
 0x246   :  { %v547_v29 = vadd.f32 %v544_v59, %v543_v53 }
 0x248   :  { %v548_v38 = vadd.f32 %v547_v29, %v545_v54 }
 0x24a   :  { %v549_v19 = vadd.f32 %v548_v38, %v546_v55 }
 0x24c   :  { %550 = vadd.xlane.f32.xlu0 %v549_v19 }
 0x2d5   :  { %v551_v24 = vpop.xlane.xlu0 %550 }
 0x2d6   :  { %v552_v18 = vmul.f32 0.001953125, %v551_v24 }
 0x2d8   :  { %v553_v30 = vsub.f32 %v543_v53, %v552_v18  ;;  %v554_v60 = vsub.f32 %v544_v59, %v552_v18  ;;  %v555_v34 = vsub.f32 %v545_v54, %v552_v18  ;;  %v556_v20 = vsub.f32 %v546_v55, %v552_v18 }
 0x2da   :  { %v557_v47 = vmul.f32 %v553_v30, %v553_v30  ;;  %v558_v21 = vmul.f32 %v554_v60, %v554_v60  ;;  %v559_v22 = vmul.f32 %v555_v34, %v555_v34  ;;  %v560_v26 = vmul.f32 %v556_v20, %v556_v20 }
 0x2dc   :  { %v561_v25 = vadd.f32 %v558_v21, %v557_v47 }
 0x2de   :  { %v562_v44 = vadd.f32 %v561_v25, %v559_v22 }
 0x2e0   :  { %v563_v31 = vadd.f32 %v562_v44, %v560_v26 }
 0x2e2   :  { %564 = vadd.xlane.f32.xlu1 %v563_v31 }
 0x36b   :  { %v565_v57 = vpop.xlane.xlu1 %564 }
 0x36c   :  { %v566_v48 = vmul.f32 0.001953125, %v565_v57 }
 0x36e   :  { %v567_v40 = vadd.f32 1e-05, %v566_v48 }
 0x370   :  { %677 = vrsqrt.f32 %v567_v40 }
 0x37d   :  { %v678_v23 = vpop.eup %677 }
 0x37e   :  { %v569_v28 = vmul.f32 %v678_v23, %v553_v30  ;;  %v570_v63 = vmul.f32 %v678_v23, %v554_v60  ;;  %v571_v35 = vmul.f32 %v678_v23, %v555_v34  ;;  %v572_v46 = vmul.f32 %v678_v23, %v556_v20 }
 0x380   :  { %v575_v51 = vmul.f32 %v574_v41, %v569_v28  ;;  %v576_v32 = vmul.f32 %v574_v41, %v570_v63  ;;  %v577_v27 = vmul.f32 %v574_v41, %v571_v35  ;;  %v578_v52 = vmul.f32 %v574_v41, %v572_v46 }
 0x382   :  { %v581_v33 = vadd.f32 %v580_v37, %v575_v51  ;;  %v582_v56 = vadd.f32 %v580_v37, %v576_v32  ;;  %v583_v42 = vadd.f32 %v580_v37, %v577_v27  ;;  %v584_v58 = vadd.f32 %v580_v37, %v578_v52 }
 0x384   :  { %v585_v43 = vsub.f32 0.0, %v581_v33  ;;  %v586_v36 = vsub.f32 0.0, %v582_v56  ;;  %v587_v45 = vsub.f32 0.0, %v583_v42  ;;  %v588_v61 = vsub.f32 0.0, %v584_v58 }
 0x386   :  { %v589_v50 = vmul.f32 1.442695, %v585_v43  ;;  %v591_v62 = vmul.f32 1.442695, %v586_v36  ;;  %v593_v39 = vmul.f32 1.442695, %v587_v45 }
 0x387   :  { %v595_v16 = vmul.f32 1.442695, %v588_v61 }
 0x388   :  { %679 = vpow2.f32 %v589_v50 }
 0x389   :  { %681 = vpow2.f32 %v591_v62 }
 0x38a   :  { %683 = vpow2.f32 %v593_v39 }
 0x38b   :  { %685 = vpow2.f32 %v595_v16 }
 0x395   :  { %v680_v17 = vpop.eup %679 }
 0x396   :  { %v682_v49 = vpop.eup %681  ;;  %v597_v53 = vadd.f32 1.0, %v680_v17 }
 0x397   :  { %v684_v59 = vpop.eup %683  ;;  %v598_v54 = vadd.f32 1.0, %v682_v49 }
 0x398   :  { %v686_v29 = vpop.eup %685  ;;  %v599_v55 = vadd.f32 1.0, %v684_v59  ;;  %687 = vrcp.f32 %v597_v53 }
 0x399   :  { %v600_v38 = vadd.f32 1.0, %v686_v29  ;;  %689 = vrcp.f32 %v598_v54 }
 0x39a   :  { %691 = vrcp.f32 %v599_v55 }
 0x39b   :  { %693 = vrcp.f32 %v600_v38 }
 0x3a5   :  { %v688_v19 = vpop.eup %687 }
 0x3a6   :  { %v690_v24 = vpop.eup %689  ;;  %v609_v18 = vmul.f32 %v688_v19, %v843_v14  ;;  %v611_v30 = vmul.f32 %v688_v19, %v819_v10  ;;  %v613_v60 = vmul.f32 %v688_v19, %v797_v6  ;;  %v615_v34 = vmul.f32 %v688_v19, %v773_v2 }
 0x3a7   :  { %v692_v20 = vpop.eup %691  ;;  %v610_v47 = vmul.f32 %v690_v24, %v831_v12  ;;  %v612_v21 = vmul.f32 %v690_v24, %v807_v8  ;;  %v614_v22 = vmul.f32 %v690_v24, %v785_v4  ;;  %v616_v25 = vmul.f32 %v690_v24, %v763_v0 }
 0x3a8   :  { %v694_v26 = vpop.eup %693  ;;  %617 = vst [vmem:[%s1124_s8] sm:$0xff] %v609_v18  ;;  %619 = vst [vmem:[%s1124_s8 + $0x10] sm:$0xff] %v611_v30  ;;  %v633_v2 = vmul.f32 %v692_v20, %v848_v15  ;;  %v635_v0 = vmul.f32 %v692_v20, %v824_v11  ;;  %v637_v4 = vmul.f32 %v692_v20, %v802_v7 }
 0x3a9   :  { %621 = vst [vmem:[%s1124_s8 + $0x20] sm:$0xff] %v613_v60  ;;  %623 = vst [vmem:[%s1124_s8 + $0x30] sm:$0xff] %v615_v34  ;;  %v639_v6 = vmul.f32 %v692_v20, %v780_v3  ;;  %v634_v7 = vmul.f32 %v694_v26, %v836_v13  ;;  %v636_v3 = vmul.f32 %v694_v26, %v814_v9 }
 0x3aa   :  { %618 = vst [vmem:[%s1124_s8 + $0x8] sm:$0xff] %v610_v47  ;;  %620 = vst [vmem:[%s1124_s8 + $0x18] sm:$0xff] %v612_v21  ;;  %v638_v8 = vmul.f32 %v694_v26, %v790_v5  ;;  %v640_v10 = vmul.f32 %v694_v26, %v768_v1 }
 0x3ab   :  { %622 = vst [vmem:[%s1124_s8 + $0x28] sm:$0xff] %v614_v22  ;;  %624 = vst [vmem:[%s1124_s8 + $0x38] sm:$0xff] %v616_v25 }
 0x3ac   :  { %641 = vst [vmem:[%s1124_s8 + $0x40] sm:$0xff] %v633_v2  ;;  %643 = vst [vmem:[%s1124_s8 + $0x50] sm:$0xff] %v635_v0 }
 0x3ad   :  { %645 = vst [vmem:[%s1124_s8 + $0x60] sm:$0xff] %v637_v4  ;;  %647 = vst [vmem:[%s1124_s8 + $0x70] sm:$0xff] %v639_v6 }
 0x3ae   :  { %642 = vst [vmem:[%s1124_s8 + $0x48] sm:$0xff] %v634_v7  ;;  %644 = vst [vmem:[%s1124_s8 + $0x58] sm:$0xff] %v636_v3 }
 0x3af   :  { %646 = vst [vmem:[%s1124_s8 + $0x68] sm:$0xff] %v638_v8  ;;  %648 = vst [vmem:[%s1124_s8 + $0x78] sm:$0xff] %v640_v10 }
 0x3b0   :  { %653 = vsyncpa [#allocation3], 1 }

</bundles_post_ra>
